<compile_context>
chip_gen: v5e
topology: v5e:2x2
jax: 0.10.0
libtpu: 0.0.40
codegen_flags: <defaults>
</compile_context>

<pallas_src>
import functools
import math

import jax
import jax.numpy as jnp
from jax.experimental import pallas as pl
from jax.experimental.pallas import tpu as pltpu


_VMEM_LIMIT = 32 * 1024 * 1024  # safe scoped-VMEM limit on v5e/v6e/v7x


def _pick_tile(dim, target, align):
    """Largest tile <= target that is a multiple of `align` and divides dim.

    Falls back to the full dimension (always legal for Pallas block shapes)."""
    if dim <= target:
        return dim
    t = (target // align) * align
    while t >= align:
        if dim % t == 0:
            return t
        t -= align
    return dim


# ----------------------- tiled linear (matmul) kernel --------------------------

def _linear_kernel(x_ref, w_ref, b_ref, o_ref, acc_ref, *, activation):
    k = pl.program_id(2)

    @pl.when(k == 0)
    def _():
        acc_ref[...] = jnp.zeros_like(acc_ref)

    acc_ref[...] += jnp.dot(x_ref[...].astype(jnp.bfloat16), w_ref[...],
                            preferred_element_type=jnp.float32)

    @pl.when(k == pl.num_programs(2) - 1)
    def _():
        y = acc_ref[...] + b_ref[...]
        if activation == "gelu":
            y = jax.nn.gelu(y)
        o_ref[...] = y.astype(o_ref.dtype)


def linear(x, w, b, activation=None, tm=256, tn=512, tk=512):
    """(M, K) f32 @ (K, N) bf16 + (N,) f32 -> (M, N) f32, tiled & pipelined."""
    M, K = x.shape
    N = w.shape[1]
    tm = _pick_tile(M, tm, 8)
    tn = _pick_tile(N, tn, 128)
    tk = _pick_tile(K, tk, 128)
    grid = (M // tm, N // tn, K // tk)
    return pl.pallas_call(
        functools.partial(_linear_kernel, activation=activation),
        grid=grid,
        out_shape=jax.ShapeDtypeStruct((M, N), jnp.float32),
        in_specs=[
            pl.BlockSpec((tm, tk), lambda i, j, k: (i, k)),
            pl.BlockSpec((tk, tn), lambda i, j, k: (k, j)),
            pl.BlockSpec((1, tn), lambda i, j, k: (0, j)),
        ],
        out_specs=pl.BlockSpec((tm, tn), lambda i, j, k: (i, j)),
        scratch_shapes=[pltpu.VMEM((tm, tn), jnp.float32)],
        compiler_params=pltpu.CompilerParams(
            dimension_semantics=("parallel", "parallel", "arbitrary"),
            vmem_limit_bytes=_VMEM_LIMIT),
    )(x, w, b.reshape(1, N))


# --------------- fused linear + residual-add + LayerNorm (epilogue) ------------

def _linear_res_ln_kernel(x_ref, w_ref, b_ref, r_ref, g_ref, bt_ref,
                          o_ref, acc_ref, *, eps):
    k = pl.program_id(1)

    @pl.when(k == 0)
    def _():
        acc_ref[...] = jnp.zeros_like(acc_ref)

    acc_ref[...] += jnp.dot(x_ref[...].astype(jnp.bfloat16), w_ref[...],
                            preferred_element_type=jnp.float32)

    @pl.when(k == pl.num_programs(1) - 1)
    def _():
        h = acc_ref[...] + b_ref[...] + r_ref[...]
        mu = jnp.mean(h, axis=-1, keepdims=True)
        var = jnp.mean(jnp.square(h - mu), axis=-1, keepdims=True)
        o_ref[...] = ((h - mu) * jax.lax.rsqrt(var + eps) * g_ref[...]
                      + bt_ref[...]).astype(o_ref.dtype)


def linear_residual_layernorm(x, w, b, residual, gamma, beta, eps=1e-5,
                              tm=256, tk=512):
    """LayerNorm(x @ w + b + residual); LN axis (= N) is kept whole per block."""
    M, K = x.shape
    N = w.shape[1]
    tm = _pick_tile(M, tm, 8)
    tk = _pick_tile(K, tk, 128)
    grid = (M // tm, K // tk)
    return pl.pallas_call(
        functools.partial(_linear_res_ln_kernel, eps=eps),
        grid=grid,
        out_shape=jax.ShapeDtypeStruct((M, N), jnp.float32),
        in_specs=[
            pl.BlockSpec((tm, tk), lambda i, k: (i, k)),
            pl.BlockSpec((tk, N), lambda i, k: (k, 0)),
            pl.BlockSpec((1, N), lambda i, k: (0, 0)),
            pl.BlockSpec((tm, N), lambda i, k: (i, 0)),
            pl.BlockSpec((1, N), lambda i, k: (0, 0)),
            pl.BlockSpec((1, N), lambda i, k: (0, 0)),
        ],
        out_specs=pl.BlockSpec((tm, N), lambda i, k: (i, 0)),
        scratch_shapes=[pltpu.VMEM((tm, N), jnp.float32)],
        compiler_params=pltpu.CompilerParams(
            dimension_semantics=("parallel", "arbitrary"),
            vmem_limit_bytes=_VMEM_LIMIT),
    )(x, w, b.reshape(1, N), residual, gamma.reshape(1, N), beta.reshape(1, N))


# ------------- fused FFN (w1 + GELU + w2) + residual + LayerNorm ----------------

def _ffn_res_ln_kernel(x_ref, w1_ref, b1_ref, w2_ref, b2_ref, g_ref, bt_ref,
                       o_ref, *, eps):
    x = x_ref[...]                                            # f32 (tm, D)
    h = jnp.dot(x.astype(jnp.bfloat16), w1_ref[...],
                preferred_element_type=jnp.float32) + b1_ref[...]
    h = jax.nn.gelu(h)
    y = jnp.dot(h.astype(jnp.bfloat16), w2_ref[...],
                preferred_element_type=jnp.float32) + b2_ref[...] + x
    mu = jnp.mean(y, axis=-1, keepdims=True)
    var = jnp.mean(jnp.square(y - mu), axis=-1, keepdims=True)
    o_ref[...] = ((y - mu) * jax.lax.rsqrt(var + eps) * g_ref[...]
                  + bt_ref[...]).astype(o_ref.dtype)


def ffn_residual_layernorm(x, w1, b1, w2, b2, gamma, beta, eps=1e-5, tm=256):
    M, D = x.shape
    F = w1.shape[1]
    tm = _pick_tile(M, tm, 8)
    grid = (M // tm,)
    return pl.pallas_call(
        functools.partial(_ffn_res_ln_kernel, eps=eps),
        grid=grid,
        out_shape=jax.ShapeDtypeStruct((M, D), jnp.float32),
        in_specs=[
            pl.BlockSpec((tm, D), lambda i: (i, 0)),
            pl.BlockSpec((D, F), lambda i: (0, 0)),
            pl.BlockSpec((1, F), lambda i: (0, 0)),
            pl.BlockSpec((F, D), lambda i: (0, 0)),
            pl.BlockSpec((1, D), lambda i: (0, 0)),
            pl.BlockSpec((1, D), lambda i: (0, 0)),
            pl.BlockSpec((1, D), lambda i: (0, 0)),
        ],
        out_specs=pl.BlockSpec((tm, D), lambda i: (i, 0)),
        compiler_params=pltpu.CompilerParams(
            dimension_semantics=("parallel",),
            vmem_limit_bytes=_VMEM_LIMIT),
    )(x, w1, b1.reshape(1, F), w2, b2.reshape(1, D),
      gamma.reshape(1, D), beta.reshape(1, D))


# ------------------------------- attention --------------------------------------

def _attn_kernel(q_ref, k_ref, v_ref, o_ref, *, n_heads, sm_scale, causal):
    # one batch per grid step, all heads handled in-kernel, lane-dense output
    sq = q_ref.shape[1]
    sk = k_ref.shape[1]
    dm = q_ref.shape[2]
    dh = dm // n_heads

    if causal:
        row = jax.lax.broadcasted_iota(jnp.int32, (sq, sk), 0)
        col = jax.lax.broadcasted_iota(jnp.int32, (sq, sk), 1)
        mask = col <= row + (sk - sq)

    for h in range(n_heads):
        lo, hi = h * dh, (h + 1) * dh
        qh = q_ref[0, :, lo:hi].astype(jnp.bfloat16)
        kh = k_ref[0, :, lo:hi].astype(jnp.bfloat16)
        vh = v_ref[0, :, lo:hi].astype(jnp.bfloat16)
        s = jax.lax.dot_general(qh, kh, (((1,), (1,)), ((), ())),
                                preferred_element_type=jnp.float32) * sm_scale
        if causal:
            s = jnp.where(mask, s, -1e30)       # logits kept in f32
        s = s - jnp.max(s, axis=-1, keepdims=True)
        p = jnp.exp(s)
        p = p * pl.reciprocal(jnp.sum(p, axis=-1, keepdims=True), approx=True)
        oh = jnp.dot(p.astype(jnp.bfloat16), vh,
                     preferred_element_type=jnp.float32)
        o_ref[0, :, lo:hi] = oh.astype(o_ref.dtype)


def _col_map(col):
    return lambda i: (i, 0, col)


def _attention_call(q_arr, k_arr, v_arr, qcol, kcol, vcol, dm, n_heads, causal):
    B, Sq = q_arr.shape[0], q_arr.shape[1]
    Sk = k_arr.shape[1]
    kernel = functools.partial(
        _attn_kernel, n_heads=n_heads,
        sm_scale=1.0 / math.sqrt(dm // n_heads), causal=causal)
    return pl.pallas_call(
        kernel,
        grid=(B,),
        out_shape=jax.ShapeDtypeStruct((B, Sq, dm), jnp.float32),
        in_specs=[
            pl.BlockSpec((1, Sq, dm), _col_map(qcol)),
            pl.BlockSpec((1, Sk, dm), _col_map(kcol)),
            pl.BlockSpec((1, Sk, dm), _col_map(vcol)),
        ],
        out_specs=pl.BlockSpec((1, Sq, dm), lambda i: (i, 0, 0)),
        compiler_params=pltpu.CompilerParams(
            dimension_semantics=("parallel",),
            vmem_limit_bytes=_VMEM_LIMIT),
    )(q_arr, k_arr, v_arr)


def self_attention(qkv, dm, n_heads, causal):
    """qkv: (B, S, 3*dm) packed projections -> (B, S, dm)."""
    if dm % 128 == 0:
        # select the q / k / v column blocks directly via the BlockSpec index_map
        return _attention_call(qkv, qkv, qkv, 0, 1, 2, dm, n_heads, causal)
    q = qkv[..., 0 * dm:1 * dm]
    k = qkv[..., 1 * dm:2 * dm]
    v = qkv[..., 2 * dm:3 * dm]
    return _attention_call(q, k, v, 0, 0, 0, dm, n_heads, causal)


def cross_attention(q, kv, dm, n_heads):
    """q: (B, Sq, dm), kv: (B, Sk, 2*dm) packed -> (B, Sq, dm)."""
    if dm % 128 == 0:
        return _attention_call(q, kv, kv, 0, 0, 1, dm, n_heads, False)
    k = kv[..., :dm]
    v = kv[..., dm:]
    return _attention_call(q, k, v, 0, 0, 0, dm, n_heads, False)


# ----------------------------- plain-JAX glue -----------------------------------

def _sinusoidal_pos_embedding(seq_len, d_model):
    pos = jnp.arange(seq_len, dtype=jnp.float32)[:, None]
    i = jnp.arange(d_model // 2, dtype=jnp.float32)[None, :]
    angle = pos / jnp.power(10000.0, 2.0 * i / d_model)
    pe = jnp.zeros((seq_len, d_model), jnp.float32)
    pe = pe.at[:, 0::2].set(jnp.sin(angle))
    pe = pe.at[:, 1::2].set(jnp.cos(angle))
    return pe


def _init_linear(key, fan_in, fan_out):
    w = (jax.random.normal(key, (fan_in, fan_out), jnp.float32) * 0.02
         ).astype(jnp.bfloat16)                      # MXU operands stored bf16
    b = jnp.zeros((fan_out,), jnp.float32)
    return w, b


def _ln_params(d_model):
    return (jnp.ones((d_model,), jnp.float32), jnp.zeros((d_model,), jnp.float32))


def _init_self_attention(key, dm):
    k1, k2 = jax.random.split(key)
    wqkv, bqkv = _init_linear(k1, dm, 3 * dm)        # fused Q|K|V projection
    wo, bo = _init_linear(k2, dm, dm)
    return {"wqkv": wqkv, "bqkv": bqkv, "wo": wo, "bo": bo}


def _init_cross_attention(key, dm):
    k1, k2, k3 = jax.random.split(key, 3)
    wq, bq = _init_linear(k1, dm, dm)
    wkv, bkv = _init_linear(k2, dm, 2 * dm)          # fused K|V projection
    wo, bo = _init_linear(k3, dm, dm)
    return {"wq": wq, "bq": bq, "wkv": wkv, "bkv": bkv, "wo": wo, "bo": bo}


def _init_encoder_layer(key, dm, dff):
    ka, k1, k2 = jax.random.split(key, 3)
    return {"attn": _init_self_attention(ka, dm),
            "w1": _init_linear(k1, dm, dff),
            "w2": _init_linear(k2, dff, dm),
            "ln1": _ln_params(dm), "ln2": _ln_params(dm)}


def _init_decoder_layer(key, dm, dff):
    ks, kc, k1, k2 = jax.random.split(key, 4)
    return {"self_attn": _init_self_attention(ks, dm),
            "cross_attn": _init_cross_attention(kc, dm),
            "w1": _init_linear(k1, dm, dff),
            "w2": _init_linear(k2, dff, dm),
            "ln1": _ln_params(dm), "ln2": _ln_params(dm), "ln3": _ln_params(dm)}


class InformerTimeSeriesModelPallas:
    """Pallas re-implementation of the Informer time-series wrapper's forward."""

    def __init__(self, input_dim, pred_len, output_dim, seq_len=96, label_len=48,
                 d_model=512, n_heads=8, d_ff=None, num_encoder_layers=2,
                 num_decoder_layers=2, seed=0):
        assert d_model % n_heads == 0
        self.input_dim = input_dim
        self.output_dim = output_dim
        self.pred_len = pred_len
        self.seq_len = seq_len
        self.label_len = label_len
        self.d_model = d_model
        self.n_heads = n_heads
        d_ff = 4 * d_model if d_ff is None else d_ff

        key = jax.random.PRNGKey(seed)
        k_ee, k_de, k_head, k_enc, k_dec = jax.random.split(key, 5)
        self.params = {
            "enc_embed": _init_linear(k_ee, input_dim, d_model),
            "dec_embed": _init_linear(k_de, input_dim, d_model),
            "head": _init_linear(k_head, d_model, output_dim),
            "enc_layers": [_init_encoder_layer(k, d_model, d_ff)
                           for k in jax.random.split(k_enc, num_encoder_layers)],
            "dec_layers": [_init_decoder_layer(k, d_model, d_ff)
                           for k in jax.random.split(k_dec, num_decoder_layers)],
        }

    # ---- blocks ----
    def _self_attn_block(self, h, p, ln, causal):
        B, S, dm = h.shape
        qkv = linear(h.reshape(B * S, dm), p["wqkv"], p["bqkv"]
                     ).reshape(B, S, 3 * dm)
        a = self_attention(qkv, dm, self.n_heads, causal)
        out = linear_residual_layernorm(a.reshape(B * S, dm), p["wo"], p["bo"],
                                        h.reshape(B * S, dm), *ln)
        return out.reshape(B, S, dm)

    def _cross_attn_block(self, h, enc, p, ln):
        B, Sq, dm = h.shape
        Sk = enc.shape[1]
        q = linear(h.reshape(B * Sq, dm), p["wq"], p["bq"]).reshape(B, Sq, dm)
        kv = linear(enc.reshape(B * Sk, dm), p["wkv"], p["bkv"]
                    ).reshape(B, Sk, 2 * dm)
        a = cross_attention(q, kv, dm, self.n_heads)
        out = linear_residual_layernorm(a.reshape(B * Sq, dm), p["wo"], p["bo"],
                                        h.reshape(B * Sq, dm), *ln)
        return out.reshape(B, Sq, dm)

    def _ffn_block(self, h, p, ln):
        B, S, dm = h.shape
        w1, b1 = p["w1"]
        w2, b2 = p["w2"]
        out = ffn_residual_layernorm(h.reshape(B * S, dm), w1, b1, w2, b2, *ln)
        return out.reshape(B, S, dm)

    def _encoder_layer(self, h, p):
        h = self._self_attn_block(h, p["attn"], p["ln1"], causal=False)
        return self._ffn_block(h, p, p["ln2"])

    def _decoder_layer(self, h, enc, p):
        h = self._self_attn_block(h, p["self_attn"], p["ln1"], causal=True)
        h = self._cross_attn_block(h, enc, p["cross_attn"], p["ln2"])
        return self._ffn_block(h, p, p["ln3"])

    # ---- forward ----
    def __call__(self, x):
        p = self.params
        B, S, D = x.shape
        assert S == self.seq_len and D == self.input_dim
        dm = self.d_model

        x = x.astype(jnp.float32)
        # HF mean scaler (observed mask is all ones); tiny lane-sparse op -> plain JAX
        scale = jnp.maximum(jnp.mean(jnp.abs(x), axis=1, keepdims=True), 1e-10)
        x_scaled = x / scale

        # ---------------- encoder ----------------
        enc = linear(x_scaled.reshape(B * S, D), *p["enc_embed"]).reshape(B, S, dm)
        enc = enc + _sinusoidal_pos_embedding(S, dm)[None]
        for lp in p["enc_layers"]:
            enc = self._encoder_layer(enc, lp)

        # ---------------- decoder ----------------
        L = self.label_len + self.pred_len
        dec_vals = jnp.concatenate(
            [x_scaled[:, S - self.label_len:, :],
             jnp.zeros((B, self.pred_len, D), jnp.float32)], axis=1)
        dec = linear(dec_vals.reshape(B * L, D), *p["dec_embed"]).reshape(B, L, dm)
        dec = dec + _sinusoidal_pos_embedding(L, dm)[None]
        for lp in p["dec_layers"]:
            dec = self._decoder_layer(dec, enc, lp)

        # ---------------- head -------------------
        out = linear(dec.reshape(B * L, dm), *p["head"]
                     ).reshape(B, L, self.output_dim)
        pred = out[:, -self.pred_len:, :]
        if self.output_dim == self.input_dim:
            pred = pred * scale          # undo mean scaling (plain JAX, tiny)
        return pred


# ----------------------------------- main ---------------------------------------

if __name__ == "__main__":
    B = 2
    SEQ_LEN, LABEL_LEN, PRED_LEN = 16, 8, 4
    INPUT_DIM = OUTPUT_DIM = 4

    model = InformerTimeSeriesModelPallas(
        input_dim=INPUT_DIM, pred_len=PRED_LEN, output_dim=OUTPUT_DIM,
        seq_len=SEQ_LEN, label_len=LABEL_LEN,
        d_model=32, n_heads=2, num_encoder_layers=2, num_decoder_layers=2, seed=0)

    x = jax.random.normal(jax.random.PRNGKey(0), (B, SEQ_LEN, INPUT_DIM), jnp.float32)

    y = model(x)
    y = jax.block_until_ready(y)
    assert y.shape == (B, PRED_LEN, OUTPUT_DIM), y.shape
    assert jnp.all(jnp.isfinite(y))
    print("KERNEL_OK")
</pallas_src>

<mosaic_0001>
module attributes {stable_mosaic.version = 11 : i64} {
  func.func @_linear_kernel(%arg0: i32, %arg1: i32, %arg2: i32, %arg3: memref<32x4xf32, #tpu.memory_space<vmem>>, %arg4: memref<4x32xbf16, #tpu.memory_space<vmem>>, %arg5: memref<1x32xf32, #tpu.memory_space<vmem>>, %arg6: memref<32x32xf32, #tpu.memory_space<vmem>>, %arg7: memref<32x32xf32, #tpu.memory_space<vmem>>) attributes {dimension_semantics = [#tpu.dimension_semantics<parallel>, #tpu.dimension_semantics<parallel>, #tpu.dimension_semantics<arbitrary>], iteration_bounds = array<i64: 1, 1, 1>, scalar_prefetch = 0 : i64, scratch_operands = 1 : i64, tpu.core_type = #tpu.core_type<tc>, window_params = [{transform_indices = @transform_0, window_bounds = array<i64: 32, 4>}, {transform_indices = @transform_1, window_bounds = array<i64: 4, 32>}, {transform_indices = @transform_2, window_bounds = array<i64: 1, 32>}, {transform_indices = @transform_3, window_bounds = array<i64: 32, 32>}]} {
    %c0_i32 = arith.constant 0 : i32
    %0 = arith.cmpi eq, %arg2, %c0_i32 : i32
    %1 = arith.extui %0 : i1 to i32
    %c0_i32_0 = arith.constant 0 : i32
    %2 = arith.cmpi ne, %1, %c0_i32_0 : i32
    scf.if %2 {
      %cst_10 = arith.constant 0.000000e+00 : f32
      %13 = vector.broadcast %cst_10 : f32 to vector<32x32xf32>
      %c0_11 = arith.constant 0 : index
      %c0_12 = arith.constant 0 : index
      %14 = vector.load %arg7[%c0_11, %c0_12] : memref<32x32xf32, #tpu.memory_space<vmem>>, vector<32x32xf32>
      tpu.vector_store %arg7[%c0_11, %c0_12], %13 {strides = array<i32>} : memref<32x32xf32, #tpu.memory_space<vmem>>, vector<32x32xf32>,
    } else {
    }
    %c0 = arith.constant 0 : index
    %c0_1 = arith.constant 0 : index
    %3 = vector.load %arg7[%c0, %c0_1] : memref<32x32xf32, #tpu.memory_space<vmem>>, vector<32x32xf32>
    %c0_2 = arith.constant 0 : index
    %c0_3 = arith.constant 0 : index
    %4 = vector.load %arg3[%c0_2, %c0_3] : memref<32x4xf32, #tpu.memory_space<vmem>>, vector<32x4xf32>
    %5 = arith.truncf %4 : vector<32x4xf32> to vector<32x4xbf16>
    %c0_4 = arith.constant 0 : index
    %c0_5 = arith.constant 0 : index
    %6 = vector.load %arg4[%c0_4, %c0_5] : memref<4x32xbf16, #tpu.memory_space<vmem>>, vector<4x32xbf16>
    %cst = arith.constant dense<0.000000e+00> : vector<32x32xf32>
    %7 = tpu.matmul %5, %6, %cst {dimension_numbers = #tpu.dot_dimension_numbers<[1], [0], [0], [1], [0, 0, 1, 1], [], []>} : vector<32x4xbf16>, vector<4x32xbf16>, vector<32x32xf32> -> vector<32x32xf32>
    %8 = arith.addf %3, %7 : vector<32x32xf32>
    %c0_6 = arith.constant 0 : index
    %c0_7 = arith.constant 0 : index
    %9 = vector.load %arg7[%c0_6, %c0_7] : memref<32x32xf32, #tpu.memory_space<vmem>>, vector<32x32xf32>
    tpu.vector_store %arg7[%c0_6, %c0_7], %8 {strides = array<i32>} : memref<32x32xf32, #tpu.memory_space<vmem>>, vector<32x32xf32>,
    %c0_i32_8 = arith.constant 0 : i32
    %10 = arith.cmpi eq, %arg2, %c0_i32_8 : i32
    %11 = arith.extui %10 : i1 to i32
    %c0_i32_9 = arith.constant 0 : i32
    %12 = arith.cmpi ne, %11, %c0_i32_9 : i32
    scf.if %12 {
      %c0_10 = arith.constant 0 : index
      %c0_11 = arith.constant 0 : index
      %13 = vector.load %arg7[%c0_10, %c0_11] : memref<32x32xf32, #tpu.memory_space<vmem>>, vector<32x32xf32>
      %c0_12 = arith.constant 0 : index
      %c0_13 = arith.constant 0 : index
      %14 = vector.load %arg5[%c0_12, %c0_13] : memref<1x32xf32, #tpu.memory_space<vmem>>, vector<1x32xf32>
      %15 = vector.broadcast %14 : vector<1x32xf32> to vector<32x32xf32>
      %16 = arith.addf %13, %15 : vector<32x32xf32>
      %c0_14 = arith.constant 0 : index
      %c0_15 = arith.constant 0 : index
      %17 = vector.load %arg6[%c0_14, %c0_15] : memref<32x32xf32, #tpu.memory_space<vmem>>, vector<32x32xf32>
      tpu.vector_store %arg6[%c0_14, %c0_15], %16 {strides = array<i32>} : memref<32x32xf32, #tpu.memory_space<vmem>>, vector<32x32xf32>,
    } else {
    }
    return
  }
  func.func @transform_0(%arg0: i32, %arg1: i32, %arg2: i32) -> (i32, i32) {
    %c0_i32 = arith.constant 0 : i32
    return %arg0, %arg2 : i32, i32
  }
  func.func @transform_1(%arg0: i32, %arg1: i32, %arg2: i32) -> (i32, i32) {
    %c0_i32 = arith.constant 0 : i32
    return %arg2, %arg1 : i32, i32
  }
  func.func @transform_2(%arg0: i32, %arg1: i32, %arg2: i32) -> (i32, i32) {
    %c0_i32 = arith.constant 0 : i32
    %c0_i32_0 = arith.constant 0 : i32
    return %c0_i32, %arg1 : i32, i32
  }
  func.func @transform_3(%arg0: i32, %arg1: i32, %arg2: i32) -> (i32, i32) {
    %c0_i32 = arith.constant 0 : i32
    return %arg0, %arg1 : i32, i32
  }
}

</mosaic_0001>

<bundles_post_ra>
// kernel: tpu_custom_call.1
= control target key start
LH: loop header
LB: loop body
LE: loop exit
PB: predicated region body
PF: predicated region fallthrough
CT: control target
= control target key end

     0   :  { %vm43_vm0 = vcmask 1041408   ;;  %vm20_vm1 = vcmask 261120   ;;  %vm36_vm2 = vcmask 31744   ;;  %v146_v8 = vmov 0.0   ;;  %s203_s0 = inlined_call_operand.vmem [shape: f32[32,4], index: 0, kind: input, shape index: {}]   ;;  %s204_s1 = inlined_call_operand.vmem [shape: bf16[4,32], index: 1, kind: input, shape index: {}]   ;;  %s205_s2 = inlined_call_operand.vmem [shape: f32[1,32], index: 2, kind: input, shape index: {}]   ;;  %s206_s3 = inlined_call_operand.hbm [shape: f32[32,32], index: 3, kind: output, shape index: {}]  }
   0x1   :  { %v35_v0 = vld [vmem:[%s204_s1] sm:$0x3]  ;;  %v30_v2 = vld [vmem:[%s203_s0 + $0x8] sm:$0xff]  ;;  %v31_v5 = vld [vmem:[%s203_s0 + $0x10] sm:$0xff]  ;;  %21 = vst.msk [vmem:[#allocation2] sm:$0xff] %vm20_vm1, %v146_v8 }
   0x2   :  { %v29_v1 = vld [vmem:[%s203_s0] sm:$0xff]  ;;  %v45_v3 = vsel %vm43_vm0, %v35_v0, 0  ;;  %v32_v6 = vld [vmem:[%s203_s0 + $0x18] sm:$0xff] }
   0x3   :  { %v33_v4 = vpack.c.bf16 %v30_v2, %v29_v1  ;;  %54 = vmatpush.bf16.msra.mxu0 %v45_v3  ;;  %114 = vmatpush.bf16.msra.mxu1 %v45_v3  ;;  %v34_v7 = vpack.c.bf16 %v32_v6, %v31_v5 }
   0x4   :  { %8 = vsyncpa [#allocation4], 0  ;;  %22 = vst.msk [vmem:[#allocation2 + $0x8] sm:$0xff] %vm20_vm1, %v146_v8  ;;  %v119_v17 = vld [vmem:[%s205_s2] ss:$0 sm:$0xff]  ;;  %s147_s22 = smov [#allocation3]  }
   0x5   :  { %23 = vst.msk [vmem:[#allocation2 + $0x10] sm:$0xff] %vm20_vm1, %v146_v8  ;;  %s98_s23 = sshll.u32 %s147_s22, 4  ;;  %s100_s25 = sshll.u32 %s206_s3, 4  ;;  %s99_s23 = int_to_ptr.vmem [resolvable:$true] %s98_s23  ;;  %s101_s25 = int_to_ptr.hbm [resolvable:$true] %s100_s25 }
   0x6   :  { %112 = vmatmul.msk.bf16.vlgmr.msra.gmra.mxu0 %vm36_vm2, %v33_v4  ;;  %113 = vmatmul.msk.bf16.vlgmr.msra.gmra.mxu1 %vm36_vm2, %v34_v7  ;;  %24 = vst.msk [vmem:[#allocation2 + $0x18] sm:$0xff] %vm20_vm1, %v146_v8  ;;  %s148_s26 = smov 128   ;;  %s149_s27 = smov 8  }
   0x8   :  { %v25_v9 = vld [vmem:[#allocation2] sm:$0xff] }
   0xb   :  { %v26_v15 = vld [vmem:[#allocation2 + $0x8] sm:$0xff] }
   0xc   :  { %v27_v10 = vld [vmem:[#allocation2 + $0x10] sm:$0xff] }
   0xd   :  { %v28_v16 = vld [vmem:[#allocation2 + $0x18] sm:$0xff] }
  0x83   :  { %v56_v11 = vpop.f32.mrf.mxu0  ;;  %v61_v12 = vpop.f32.mrf.mxu1 }
  0x84   :  { %v66_v13 = vadd.f32 %v56_v11, %v25_v9  ;;  %v68_v14 = vadd.f32 %v61_v12, %v27_v10 }
  0x86   :  { %71 = vst.msk [vmem:[#allocation2] sm:$0xff] %vm20_vm1, %v66_v13 }
  0x87   :  { %73 = vst.msk [vmem:[#allocation2 + $0x10] sm:$0xff] %vm20_vm1, %v68_v14 }
  0x8b   :  { %v58_v18 = vpop.f32.mrf.mxu0  ;;  %v63_v19 = vpop.f32.mrf.mxu1 }
  0x8c   :  { %v67_v20 = vadd.f32 %v58_v18, %v26_v15  ;;  %v69_v21 = vadd.f32 %v63_v19, %v28_v16 }
  0x8d   :  { %v78_v22 = vld [vmem:[#allocation2] sm:$0xff] }
  0x8e   :  { %72 = vst.msk [vmem:[#allocation2 + $0x8] sm:$0xff] %vm20_vm1, %v67_v20  ;;  %v80_v23 = vld [vmem:[#allocation2 + $0x10] sm:$0xff]  ;;  %v86_v24 = vadd.f32 %v119_v17, %v78_v22 }
  0x8f   :  { %74 = vst.msk [vmem:[#allocation2 + $0x18] sm:$0xff] %vm20_vm1, %v69_v21  ;;  %v88_v25 = vadd.f32 %v119_v17, %v80_v23 }
  0x90   :  { %90 = vst.msk [vmem:[#allocation3] sm:$0xff] %vm20_vm1, %v86_v24 }
  0x91   :  { %92 = vst.msk [vmem:[#allocation3 + $0x10] sm:$0xff] %vm20_vm1, %v88_v25 }
  0x95   :  { %v79_v26 = vld [vmem:[#allocation2 + $0x8] sm:$0xff] }
  0x96   :  { %v81_v27 = vld [vmem:[#allocation2 + $0x18] sm:$0xff]  ;;  %v87_v28 = vadd.f32 %v119_v17, %v79_v26 }
  0x97   :  { %v89_v29 = vadd.f32 %v119_v17, %v81_v27 }
  0x98   :  { %91 = vst.msk [vmem:[#allocation3 + $0x8] sm:$0xff] %vm20_vm1, %v87_v28 }
  0x99   :  { %93 = vst.msk [vmem:[#allocation3 + $0x18] sm:$0xff] %vm20_vm1, %v89_v29 }
  0x9a   :  { %106 = dma.vmem_to_hbm [thread:$0]  %s99_s23, 512, %s101_s25, [#allocation4], %s148_s26, %s148_s26, %s149_s27  }
  0x9b   :  { %144 = dma.done.wait [#allocation4], 512  }
  0x9c   :  { %145 = vsyncadd [#allocation4], 4294966784 }
  0x9d   :  { %111 = vsyncpa [#allocation4], 1 }

</bundles_post_ra>
